<compile_context>
chip_gen: v7x
topology: tpu7x:2x2x1
jax: 0.10.0
libtpu: 0.0.40
codegen_flags: <defaults>
</compile_context>

<pallas_src>
import functools

import jax
import jax.numpy as jnp
from jax.experimental import pallas as pl
from jax.experimental.pallas import tpu as pltpu

EPS = 1e-5


def _vmem_limit_bytes():
    # Generation-aware VMEM budget: ~75% of physical per-core VMEM
    # (~96 MiB on v5e/v6e with 128 MiB, ~48 MiB on v7x with 64 MiB).
    try:
        cap = int(pltpu.get_tpu_info().vmem_capacity_bytes)
        return max(32 * 1024 * 1024, (cap * 3) // 4)
    except Exception:
        return 48 * 1024 * 1024


_VMEM_LIMIT = _vmem_limit_bytes()


def _round_up(x, m):
    return (x + m - 1) // m * m


def _row_tile(nrows, max_tile=1024):
    """Row tile for Kernel A: multiple of 8, <= max_tile, and (when the
    problem is big enough) at least 2 grid steps so both v7x TensorCores get
    work and the DMA pipeline has something to overlap."""
    if nrows <= 16:
        return _round_up(nrows, 8)
    half = _round_up(pl.cdiv(nrows, 2), 8)
    return min(max_tile, half)


def _batch_tile(n, h, target_rows=256):
    """Images per Kernel-B grid step: largest divisor Nb of n with
    Nb*h <= target_rows (feeds the 256-deep MXU), but prefer >= 2 grid steps
    when the merged tile would still be small."""
    best = 1
    for nb in range(1, n + 1):
        if n % nb == 0 and nb * h <= target_rows:
            best = nb
    if best == n and n > 1 and 2 * best * h <= target_rows:
        for nb in range(best - 1, 0, -1):
            if n % nb == 0:
                return nb
    return best


# ---------------------------------------------------------------------------
# Kernel A: conv1 (1x1) as a packed lane-dense bf16 matmul + BN partial stats.
#   grid = (num_row_tiles,), dimension_semantics=("parallel",)
# ---------------------------------------------------------------------------
def _conv1_stats_kernel(x_ref, w_ref, z_ref, s_ref):
    z = jnp.dot(x_ref[...], w_ref[...], preferred_element_type=jnp.float32)
    z_ref[...] = z.astype(z_ref.dtype)
    # Per-tile partial sums for train-mode BatchNorm, one lane-dense store.
    s_ref[...] = jnp.concatenate(
        [jnp.sum(z, axis=0, keepdims=True),
         jnp.sum(z * z, axis=0, keepdims=True)], axis=0)


def conv1_and_stats(x_packed, w1_big, *, tile_rows):
    nr, kin = x_packed.shape
    wc = w1_big.shape[1]
    num_tiles = nr // tile_rows
    return pl.pallas_call(
        _conv1_stats_kernel,
        out_shape=(
            jax.ShapeDtypeStruct((nr, wc), jnp.bfloat16),           # conv1 out z
            jax.ShapeDtypeStruct((num_tiles, 2, wc), jnp.float32),  # partial stats
        ),
        grid=(num_tiles,),
        in_specs=[
            pl.BlockSpec((tile_rows, kin), lambda i: (i, 0)),
            pl.BlockSpec((kin, wc), lambda i: (0, 0)),
        ],
        out_specs=(
            pl.BlockSpec((tile_rows, wc), lambda i: (i, 0)),
            pl.BlockSpec((None, 2, wc), lambda i: (i, 0, 0)),
        ),
        compiler_params=pltpu.CompilerParams(
            dimension_semantics=("parallel",),
            vmem_limit_bytes=_VMEM_LIMIT),
    )(x_packed, w1_big)


# ---------------------------------------------------------------------------
# Kernel B: fused BN-normalize + ReLU + 3x3 conv (single K=3*WC bf16 matmul
#           against a stacked banded weight) + 1x1 pred conv + sigmoid
#           modulation.  grid over row tiles of Nb whole images.
# ---------------------------------------------------------------------------
def _mod_block_kernel(z_ref, scale_ref, shift_ref, wband_ref, b2_ref,
                      wp_ref, bp_ref, e_ref, out_ref, pred_ref, *,
                      status, img_rows):
    M, WC = z_ref.shape

    # Fused BatchNorm (precomputed per-lane scale/shift) + ReLU.
    z = z_ref[...].astype(jnp.float32)
    y = jnp.maximum(z * scale_ref[...] + shift_ref[...], 0.0)

    # Vertical 3x3-conv taps built in-register.  The tile holds Nb stacked
    # images of img_rows rows each; (row % img_rows) masks both the image
    # top/bottom zero-padding and any roll leakage across image boundaries.
    row = jax.lax.broadcasted_iota(jnp.int32, (M, WC), 0) % img_rows
    y_up = jnp.where(row >= 1, pltpu.roll(y, 1, axis=0), 0.0)                 # y[h-1]
    y_dn = jnp.where(row <= img_rows - 2, pltpu.roll(y, M - 1, axis=0), 0.0)  # y[h+1]

    # 3x3 conv as ONE MXU matmul: vertical taps concatenated along lanes
    # (K = 3*WC), horizontal taps folded into the banded weight; bf16
    # operands, f32 accumulation.
    taps = jnp.concatenate([y_up, y, y_dn], axis=1).astype(jnp.bfloat16)
    feat = jnp.dot(taps, wband_ref[...], preferred_element_type=jnp.float32)
    feat = feat + b2_ref[...]

    # Prediction map: packed 1x1 conv + bias (bf16 operands, f32 acc).
    pred = jnp.dot(feat.astype(jnp.bfloat16), wp_ref[...],
                   preferred_element_type=jnp.float32) + bp_ref[...]
    pred_ref[...] = pred

    if status:
        # Broadcast sigmoid(pred) across channels via a tiny expansion matmul.
        gate = jnp.dot(jax.nn.sigmoid(pred).astype(jnp.bfloat16), e_ref[...],
                       preferred_element_type=jnp.float32)
        out_ref[...] = feat * gate
    else:
        out_ref[...] = feat


def mod_block(z2d, scale_p, shift_p, wband_big, b2_p, wp_big, bp_row, e_mat,
              *, status, img_rows, rows_per_step):
    NR, WC = z2d.shape
    K3 = wband_big.shape[0]
    W = wp_big.shape[1]
    num_steps = NR // rows_per_step
    kern = functools.partial(_mod_block_kernel, status=status,
                             img_rows=img_rows)
    return pl.pallas_call(
        kern,
        out_shape=(
            jax.ShapeDtypeStruct((NR, WC), jnp.float32),
            jax.ShapeDtypeStruct((NR, W), jnp.float32),
        ),
        grid=(num_steps,),
        in_specs=[
            pl.BlockSpec((rows_per_step, WC), lambda i: (i, 0)),   # z (bf16)
            pl.BlockSpec((1, WC), lambda i: (0, 0)),               # BN scale (packed)
            pl.BlockSpec((1, WC), lambda i: (0, 0)),               # BN shift (packed)
            pl.BlockSpec((K3, WC), lambda i: (0, 0)),              # stacked banded 3x3 weight
            pl.BlockSpec((1, WC), lambda i: (0, 0)),               # conv2 bias (packed)
            pl.BlockSpec((WC, W), lambda i: (0, 0)),               # pred weight (packed)
            pl.BlockSpec((1, W), lambda i: (0, 0)),                # pred bias row
            pl.BlockSpec((W, WC), lambda i: (0, 0)),               # channel-broadcast matrix
        ],
        out_specs=(
            pl.BlockSpec((rows_per_step, WC), lambda i: (i, 0)),
            pl.BlockSpec((rows_per_step, W), lambda i: (i, 0)),
        ),
        compiler_params=pltpu.CompilerParams(
            dimension_semantics=("parallel",),
            vmem_limit_bytes=_VMEM_LIMIT),
    )(z2d, scale_p, shift_p, wband_big, b2_p, wp_big, bp_row, e_mat)


# ---------------------------------------------------------------------------
# ConvBlock forward (JAX glue: layout packing, tiny BN-stat finalization,
# host-side weight packing — all O(C^2 * W^2) one-time work).
# ---------------------------------------------------------------------------
def conv_block_forward(x_nchw, params, status=True):
    N, Cin, H, W = x_nchw.shape
    Cmid = params["conv1_w"].shape[0]
    WC = W * Cmid
    NR = N * H

    # Pack to lane-dense layout: [N*H, W*Cin]  (channels fastest on lanes).
    x_packed = jnp.transpose(x_nchw, (0, 2, 3, 1)).reshape(NR, W * Cin)
    x_packed = x_packed.astype(jnp.bfloat16)

    # conv1 weight as a block-diagonal packed matmul weight: kron(I_W, W1).
    w1 = jnp.transpose(params["conv1_w"][:, :, 0, 0], (1, 0))          # [Cin, Cmid]
    w1_big = jnp.kron(jnp.eye(W, dtype=jnp.float32), w1).astype(jnp.bfloat16)

    # --- Kernel A: conv1 + partial BN statistics, tiled & pipelined over rows.
    tile_rows = _row_tile(NR)
    grid_a = pl.cdiv(NR, tile_rows)
    nr_pad = grid_a * tile_rows
    if nr_pad != NR:
        # Zero rows contribute nothing to the BN sums; count uses true N*H*W.
        x_packed = jnp.pad(x_packed, ((0, nr_pad - NR), (0, 0)))
    z_pad, stats = conv1_and_stats(x_packed, w1_big, tile_rows=tile_rows)
    z = z_pad if nr_pad == NR else z_pad[:NR]

    # --- Finalize train-mode BatchNorm statistics (tiny O(C) reduction).
    # TODO(synk): E[z^2]-mean^2 in f32 can cancel for large-mean activations;
    #             use a Welford-style merge if exact BN parity is required.
    sums = jnp.sum(stats, axis=0).reshape(2, W, Cmid).sum(axis=1)      # [2, Cmid]
    cnt = jnp.float32(N * H * W)
    mean = sums[0] / cnt
    var = sums[1] / cnt - mean * mean           # biased variance (training mode)
    inv = jax.lax.rsqrt(var + EPS)
    # conv1 bias cancels exactly under train-mode BN, so it is never applied.
    scale_c = params["bn1_gamma"] * inv
    shift_c = params["bn1_beta"] - mean * scale_c
    scale_p = jnp.tile(scale_c, W).reshape(1, WC)
    shift_p = jnp.tile(shift_c, W).reshape(1, WC)

    # --- Pack modulation-block weights (bf16 MXU operands, f32 biases).
    w2 = jnp.transpose(params["conv2_w"], (2, 3, 1, 0))                # [kh, kw, ci, co]
    bands = []
    for kh in range(3):
        band = jnp.zeros((WC, WC), jnp.float32)
        for kw in range(3):
            band = band + jnp.kron(
                jnp.eye(W, k=-(kw - 1), dtype=jnp.float32), w2[kh, kw])
        bands.append(band)
    wband_big = jnp.concatenate(bands, axis=0).astype(jnp.bfloat16)    # [3*WC, WC]
    b2_p = jnp.tile(params["conv2_b"], W).reshape(1, WC)
    wp = params["pred_w"][0, :, 0, 0].reshape(Cmid, 1)                 # [Cmid, 1]
    wp_big = jnp.kron(jnp.eye(W, dtype=jnp.float32),
                      wp).astype(jnp.bfloat16)                         # [WC, W]
    bp_row = jnp.full((1, W), params["pred_b"][0], jnp.float32)
    e_mat = jnp.kron(jnp.eye(W, dtype=jnp.float32),
                     jnp.ones((1, Cmid), jnp.float32)).astype(jnp.bfloat16)  # [W, WC]

    # --- Kernel B: fused BN + ReLU + 3x3 conv + pred map + sigmoid modulation.
    nb = _batch_tile(N, H)
    out_p, pred = mod_block(z, scale_p, shift_p, wband_big, b2_p, wp_big,
                            bp_row, e_mat, status=status,
                            img_rows=H, rows_per_step=nb * H)

    out = jnp.transpose(out_p.reshape(N, H, W, Cmid), (0, 3, 1, 2))    # NCHW
    pred_map = pred.reshape(N, H, W)[:, None, :, :]                    # [N,1,H,W]
    return out, pred_map


def init_params(key, in_ch, mid_ch):
    ks = jax.random.split(key, 6)
    return {
        # PyTorch-layout parameters.
        "conv1_w": 0.1 * jax.random.normal(ks[0], (mid_ch, in_ch, 1, 1), jnp.float32),
        "conv1_b": 0.1 * jax.random.normal(ks[1], (mid_ch,), jnp.float32),  # cancels under BN
        "bn1_gamma": jnp.ones((mid_ch,), jnp.float32),
        "bn1_beta": jnp.zeros((mid_ch,), jnp.float32),
        "conv2_w": 0.1 * jax.random.normal(ks[2], (mid_ch, mid_ch, 3, 3), jnp.float32),
        "conv2_b": 0.1 * jax.random.normal(ks[3], (mid_ch,), jnp.float32),
        "pred_w": 0.1 * jax.random.normal(ks[4], (1, mid_ch, 1, 1), jnp.float32),
        "pred_b": 0.1 * jax.random.normal(ks[5], (1,), jnp.float32),
    }


if __name__ == "__main__":
    N, in_ch, mid_ch, H, W = 2, 4, 8, 16, 16
    key = jax.random.PRNGKey(0)
    kx, kp = jax.random.split(key)
    x = jax.random.normal(kx, (N, in_ch, H, W), jnp.float32)
    params = init_params(kp, in_ch, mid_ch)

    fwd = jax.jit(functools.partial(conv_block_forward, status=True))
    out, pred_map = fwd(x, params)
    jax.block_until_ready(out)
    jax.block_until_ready(pred_map)

    assert out.shape == (N, mid_ch, H, W), out.shape
    assert pred_map.shape == (N, 1, H, W), pred_map.shape
    print("KERNEL_OK")
</pallas_src>

<mosaic_0001>
module attributes {stable_mosaic.version = 11 : i64} {
  func.func @_conv1_stats_kernel(%arg0: i32, %arg1: memref<16x64xbf16, #tpu.memory_space<vmem>>, %arg2: memref<64x128xbf16, #tpu.memory_space<vmem>>, %arg3: memref<16x128xbf16, #tpu.memory_space<vmem>>, %arg4: memref<1x2x128xf32, #tpu.memory_space<vmem>>) attributes {dimension_semantics = [#tpu.dimension_semantics<parallel>], iteration_bounds = array<i64: 2>, scalar_prefetch = 0 : i64, scratch_operands = 0 : i64, tpu.core_type = #tpu.core_type<tc>, window_params = [{transform_indices = @transform_0, window_bounds = array<i64: 16, 64>}, {pipeline_mode = #tpu.pipeline_mode<synchronous>, transform_indices = @transform_1, window_bounds = array<i64: 64, 128>}, {transform_indices = @transform_2, window_bounds = array<i64: 16, 128>}, {transform_indices = @transform_3, window_bounds = array<i64: 1, 2, 128>}]} {
    %c0 = arith.constant 0 : index
    %c0_0 = arith.constant 0 : index
    %0 = vector.load %arg1[%c0, %c0_0] : memref<16x64xbf16, #tpu.memory_space<vmem>>, vector<16x64xbf16>
    %c0_1 = arith.constant 0 : index
    %c0_2 = arith.constant 0 : index
    %1 = vector.load %arg2[%c0_1, %c0_2] : memref<64x128xbf16, #tpu.memory_space<vmem>>, vector<64x128xbf16>
    %cst = arith.constant dense<0.000000e+00> : vector<16x128xf32>
    %2 = tpu.matmul %0, %1, %cst {dimension_numbers = #tpu.dot_dimension_numbers<[1], [0], [0], [1], [0, 0, 1, 1], [], []>} : vector<16x64xbf16>, vector<64x128xbf16>, vector<16x128xf32> -> vector<16x128xf32>
    %3 = arith.truncf %2 : vector<16x128xf32> to vector<16x128xbf16>
    %c0_3 = arith.constant 0 : index
    %c0_4 = arith.constant 0 : index
    %4 = vector.load %arg3[%c0_3, %c0_4] : memref<16x128xbf16, #tpu.memory_space<vmem>>, vector<16x128xbf16>
    tpu.vector_store %arg3[%c0_3, %c0_4], %3 {strides = array<i32>} : memref<16x128xbf16, #tpu.memory_space<vmem>>, vector<16x128xbf16>,
    %cst_5 = arith.constant dense<0.000000e+00> : vector<128xf32>
    %5 = vector.multi_reduction <add>, %2, %cst_5 [0] : vector<16x128xf32> to vector<128xf32>
    %6 = vector.shape_cast %5 : vector<128xf32> to vector<1x128xf32>
    %7 = arith.mulf %2, %2 : vector<16x128xf32>
    %cst_6 = arith.constant dense<0.000000e+00> : vector<128xf32>
    %8 = vector.multi_reduction <add>, %7, %cst_6 [0] : vector<16x128xf32> to vector<128xf32>
    %9 = vector.shape_cast %8 : vector<128xf32> to vector<1x128xf32>
    %10 = tpu.concatenate %6, %9 in 0 : vector<1x128xf32>, vector<1x128xf32> -> vector<2x128xf32>
    %c0_7 = arith.constant 0 : index
    %c0_8 = arith.constant 0 : index
    %c0_9 = arith.constant 0 : index
    %11 = vector.load %arg4[%c0_7, %c0_8, %c0_9] : memref<1x2x128xf32, #tpu.memory_space<vmem>>, vector<1x2x128xf32>
    %12 = vector.shape_cast %11 : vector<1x2x128xf32> to vector<2x128xf32>
    %13 = vector.shape_cast %10 : vector<2x128xf32> to vector<1x2x128xf32>
    tpu.vector_store %arg4[%c0_7, %c0_8, %c0_9], %13 {strides = array<i32>} : memref<1x2x128xf32, #tpu.memory_space<vmem>>, vector<1x2x128xf32>,
    return
  }
  func.func @transform_0(%arg0: i32) -> (i32, i32) {
    %c0_i32 = arith.constant 0 : i32
    %c0_i32_0 = arith.constant 0 : i32
    return %arg0, %c0_i32 : i32, i32
  }
  func.func @transform_1(%arg0: i32) -> (i32, i32) {
    %c0_i32 = arith.constant 0 : i32
    %c0_i32_0 = arith.constant 0 : i32
    %c0_i32_1 = arith.constant 0 : i32
    return %c0_i32, %c0_i32_0 : i32, i32
  }
  func.func @transform_2(%arg0: i32) -> (i32, i32) {
    %c0_i32 = arith.constant 0 : i32
    %c0_i32_0 = arith.constant 0 : i32
    return %arg0, %c0_i32 : i32, i32
  }
  func.func @transform_3(%arg0: i32) -> (i32, i32, i32) {
    %c0_i32 = arith.constant 0 : i32
    %c0_i32_0 = arith.constant 0 : i32
    %c0_i32_1 = arith.constant 0 : i32
    return %arg0, %c0_i32, %c0_i32_0 : i32, i32, i32
  }
}

module attributes {stable_mosaic.version = 11 : i64} {
  func.func @_mod_block_kernel(%arg0: i32, %arg1: memref<16x128xbf16, #tpu.memory_space<vmem>>, %arg2: memref<1x128xf32, #tpu.memory_space<vmem>>, %arg3: memref<1x128xf32, #tpu.memory_space<vmem>>, %arg4: memref<384x128xbf16, #tpu.memory_space<vmem>>, %arg5: memref<1x128xf32, #tpu.memory_space<vmem>>, %arg6: memref<128x16xbf16, #tpu.memory_space<vmem>>, %arg7: memref<1x16xf32, #tpu.memory_space<vmem>>, %arg8: memref<16x128xbf16, #tpu.memory_space<vmem>>, %arg9: memref<16x128xf32, #tpu.memory_space<vmem>>, %arg10: memref<16x16xf32, #tpu.memory_space<vmem>>) attributes {dimension_semantics = [#tpu.dimension_semantics<parallel>], iteration_bounds = array<i64: 2>, scalar_prefetch = 0 : i64, scratch_operands = 0 : i64, tpu.core_type = #tpu.core_type<tc>, window_params = [{transform_indices = @transform_0, window_bounds = array<i64: 16, 128>}, {pipeline_mode = #tpu.pipeline_mode<synchronous>, transform_indices = @transform_1, window_bounds = array<i64: 1, 128>}, {pipeline_mode = #tpu.pipeline_mode<synchronous>, transform_indices = @transform_2, window_bounds = array<i64: 1, 128>}, {pipeline_mode = #tpu.pipeline_mode<synchronous>, transform_indices = @transform_3, window_bounds = array<i64: 384, 128>}, {pipeline_mode = #tpu.pipeline_mode<synchronous>, transform_indices = @transform_4, window_bounds = array<i64: 1, 128>}, {pipeline_mode = #tpu.pipeline_mode<synchronous>, transform_indices = @transform_5, window_bounds = array<i64: 128, 16>}, {pipeline_mode = #tpu.pipeline_mode<synchronous>, transform_indices = @transform_6, window_bounds = array<i64: 1, 16>}, {pipeline_mode = #tpu.pipeline_mode<synchronous>, transform_indices = @transform_7, window_bounds = array<i64: 16, 128>}, {transform_indices = @transform_8, window_bounds = array<i64: 16, 128>}, {transform_indices = @transform_9, window_bounds = array<i64: 16, 16>}]} {
    %c0 = arith.constant 0 : index
    %c0_0 = arith.constant 0 : index
    %0 = vector.load %arg1[%c0, %c0_0] : memref<16x128xbf16, #tpu.memory_space<vmem>>, vector<16x128xbf16>
    %1 = arith.extf %0 : vector<16x128xbf16> to vector<16x128xf32>
    %c0_1 = arith.constant 0 : index
    %c0_2 = arith.constant 0 : index
    %2 = vector.load %arg2[%c0_1, %c0_2] : memref<1x128xf32, #tpu.memory_space<vmem>>, vector<1x128xf32>
    %3 = vector.broadcast %2 : vector<1x128xf32> to vector<16x128xf32>
    %4 = arith.mulf %1, %3 : vector<16x128xf32>
    %c0_3 = arith.constant 0 : index
    %c0_4 = arith.constant 0 : index
    %5 = vector.load %arg3[%c0_3, %c0_4] : memref<1x128xf32, #tpu.memory_space<vmem>>, vector<1x128xf32>
    %6 = vector.broadcast %5 : vector<1x128xf32> to vector<16x128xf32>
    %7 = arith.addf %4, %6 : vector<16x128xf32>
    %cst = arith.constant 0.000000e+00 : f32
    %8 = vector.broadcast %cst : f32 to vector<16x128xf32>
    %9 = arith.maximumf %7, %8 : vector<16x128xf32>
    %10 = tpu.iota {dimensions = array<i32: 0>} : vector<16x128xi32>
    %c16_i32 = arith.constant 16 : i32
    %c0_i32 = arith.constant 0 : i32
    %11 = arith.cmpi eq, %c16_i32, %c0_i32 : i32
    %c1_i32 = arith.constant 1 : i32
    %12 = arith.select %11, %c1_i32, %c16_i32 : i32
    %13 = vector.broadcast %12 : i32 to vector<16x128xi32>
    %14 = arith.remsi %10, %13 : vector<16x128xi32>
    %c0_i32_5 = arith.constant 0 : i32
    %15 = vector.broadcast %c0_i32_5 : i32 to vector<16x128xi32>
    %16 = arith.cmpi ne, %14, %15 : vector<16x128xi32>
    %c0_i32_6 = arith.constant 0 : i32
    %17 = vector.broadcast %c0_i32_6 : i32 to vector<16x128xi32>
    %18 = arith.cmpi slt, %14, %17 : vector<16x128xi32>
    %c0_i32_7 = arith.constant 0 : i32
    %19 = arith.cmpi slt, %12, %c0_i32_7 : i32
    %20 = vector.broadcast %19 : i1 to vector<16x128xi1>
    %21 = vector.broadcast %20 : vector<16x128xi1> to vector<16x128xi1>
    %22 = arith.xori %18, %21 : vector<16x128xi1>
    %23 = arith.andi %22, %16 : vector<16x128xi1>
    %24 = vector.broadcast %12 : i32 to vector<16x128xi32>
    %25 = arith.addi %14, %24 : vector<16x128xi32>
    %26 = arith.select %23, %25, %14 : vector<16x128xi1>, vector<16x128xi32>
    %c1_i32_8 = arith.constant 1 : i32
    %27 = vector.broadcast %c1_i32_8 : i32 to vector<16x128xi32>
    %28 = arith.cmpi sge, %26, %27 : vector<16x128xi32>
    %c1_i32_9 = arith.constant 1 : i32
    %29 = tpu.dynamic_rotate %9 by %c1_i32_9 dim 0 : vector<16x128xf32>, i32 -> vector<16x128xf32>
    %cst_10 = arith.constant 0.000000e+00 : f32
    %30 = vector.broadcast %cst_10 : f32 to vector<16x128xf32>
    %31 = arith.select %28, %29, %30 : vector<16x128xi1>, vector<16x128xf32>
    %c14_i32 = arith.constant 14 : i32
    %32 = vector.broadcast %c14_i32 : i32 to vector<16x128xi32>
    %33 = arith.cmpi sle, %26, %32 : vector<16x128xi32>
    %c15_i32 = arith.constant 15 : i32
    %34 = tpu.dynamic_rotate %9 by %c15_i32 dim 0 : vector<16x128xf32>, i32 -> vector<16x128xf32>
    %cst_11 = arith.constant 0.000000e+00 : f32
    %35 = vector.broadcast %cst_11 : f32 to vector<16x128xf32>
    %36 = arith.select %33, %34, %35 : vector<16x128xi1>, vector<16x128xf32>
    %37 = tpu.concatenate %31, %9, %36 in 1 : vector<16x128xf32>, vector<16x128xf32>, vector<16x128xf32> -> vector<16x384xf32>
    %38 = arith.truncf %37 : vector<16x384xf32> to vector<16x384xbf16>
    %c0_12 = arith.constant 0 : index
    %c0_13 = arith.constant 0 : index
    %39 = vector.load %arg4[%c0_12, %c0_13] : memref<384x128xbf16, #tpu.memory_space<vmem>>, vector<384x128xbf16>
    %cst_14 = arith.constant dense<0.000000e+00> : vector<16x128xf32>
    %40 = tpu.matmul %38, %39, %cst_14 {dimension_numbers = #tpu.dot_dimension_numbers<[1], [0], [0], [1], [0, 0, 1, 1], [], []>} : vector<16x384xbf16>, vector<384x128xbf16>, vector<16x128xf32> -> vector<16x128xf32>
    %c0_15 = arith.constant 0 : index
    %c0_16 = arith.constant 0 : index
    %41 = vector.load %arg5[%c0_15, %c0_16] : memref<1x128xf32, #tpu.memory_space<vmem>>, vector<1x128xf32>
    %42 = vector.broadcast %41 : vector<1x128xf32> to vector<16x128xf32>
    %43 = arith.addf %40, %42 : vector<16x128xf32>
    %44 = arith.truncf %43 : vector<16x128xf32> to vector<16x128xbf16>
    %c0_17 = arith.constant 0 : index
    %c0_18 = arith.constant 0 : index
    %45 = vector.load %arg6[%c0_17, %c0_18] : memref<128x16xbf16, #tpu.memory_space<vmem>>, vector<128x16xbf16>
    %cst_19 = arith.constant dense<0.000000e+00> : vector<16x16xf32>
    %46 = tpu.matmul %44, %45, %cst_19 {dimension_numbers = #tpu.dot_dimension_numbers<[1], [0], [0], [1], [0, 0, 1, 1], [], []>} : vector<16x128xbf16>, vector<128x16xbf16>, vector<16x16xf32> -> vector<16x16xf32>
    %c0_20 = arith.constant 0 : index
    %c0_21 = arith.constant 0 : index
    %47 = vector.load %arg7[%c0_20, %c0_21] : memref<1x16xf32, #tpu.memory_space<vmem>>, vector<1x16xf32>
    %48 = vector.broadcast %47 : vector<1x16xf32> to vector<16x16xf32>
    %49 = arith.addf %46, %48 : vector<16x16xf32>
    %c0_22 = arith.constant 0 : index
    %c0_23 = arith.constant 0 : index
    %50 = vector.load %arg10[%c0_22, %c0_23] : memref<16x16xf32, #tpu.memory_space<vmem>>, vector<16x16xf32>
    tpu.vector_store %arg10[%c0_22, %c0_23], %49 {strides = array<i32>} : memref<16x16xf32, #tpu.memory_space<vmem>>, vector<16x16xf32>,
    %51 = arith.negf %49 : vector<16x16xf32>
    %52 = math.exp %51 : vector<16x16xf32>
    %cst_24 = arith.constant 1.000000e+00 : f32
    %53 = vector.broadcast %cst_24 : f32 to vector<16x16xf32>
    %54 = arith.addf %53, %52 : vector<16x16xf32>
    %55 = arith.divf %53, %54 : vector<16x16xf32>
    %56 = arith.truncf %55 : vector<16x16xf32> to vector<16x16xbf16>
    %c0_25 = arith.constant 0 : index
    %c0_26 = arith.constant 0 : index
    %57 = vector.load %arg8[%c0_25, %c0_26] : memref<16x128xbf16, #tpu.memory_space<vmem>>, vector<16x128xbf16>
    %cst_27 = arith.constant dense<0.000000e+00> : vector<16x128xf32>
    %58 = tpu.matmul %56, %57, %cst_27 {dimension_numbers = #tpu.dot_dimension_numbers<[1], [0], [0], [1], [0, 0, 1, 1], [], []>} : vector<16x16xbf16>, vector<16x128xbf16>, vector<16x128xf32> -> vector<16x128xf32>
    %59 = arith.mulf %43, %58 : vector<16x128xf32>
    %c0_28 = arith.constant 0 : index
    %c0_29 = arith.constant 0 : index
    %60 = vector.load %arg9[%c0_28, %c0_29] : memref<16x128xf32, #tpu.memory_space<vmem>>, vector<16x128xf32>
    tpu.vector_store %arg9[%c0_28, %c0_29], %59 {strides = array<i32>} : memref<16x128xf32, #tpu.memory_space<vmem>>, vector<16x128xf32>,
    return
  }
  func.func @transform_0(%arg0: i32) -> (i32, i32) {
    %c0_i32 = arith.constant 0 : i32
    %c0_i32_0 = arith.constant 0 : i32
    return %arg0, %c0_i32 : i32, i32
  }
  func.func @transform_1(%arg0: i32) -> (i32, i32) {
    %c0_i32 = arith.constant 0 : i32
    %c0_i32_0 = arith.constant 0 : i32
    %c0_i32_1 = arith.constant 0 : i32
    return %c0_i32, %c0_i32_0 : i32, i32
  }
  func.func @transform_2(%arg0: i32) -> (i32, i32) {
    %c0_i32 = arith.constant 0 : i32
    %c0_i32_0 = arith.constant 0 : i32
    %c0_i32_1 = arith.constant 0 : i32
    return %c0_i32, %c0_i32_0 : i32, i32
  }
  func.func @transform_3(%arg0: i32) -> (i32, i32) {
    %c0_i32 = arith.constant 0 : i32
    %c0_i32_0 = arith.constant 0 : i32
    %c0_i32_1 = arith.constant 0 : i32
    return %c0_i32, %c0_i32_0 : i32, i32
  }
  func.func @transform_4(%arg0: i32) -> (i32, i32) {
    %c0_i32 = arith.constant 0 : i32
    %c0_i32_0 = arith.constant 0 : i32
    %c0_i32_1 = arith.constant 0 : i32
    return %c0_i32, %c0_i32_0 : i32, i32
  }
  func.func @transform_5(%arg0: i32) -> (i32, i32) {
    %c0_i32 = arith.constant 0 : i32
    %c0_i32_0 = arith.constant 0 : i32
    %c0_i32_1 = arith.constant 0 : i32
    return %c0_i32, %c0_i32_0 : i32, i32
  }
  func.func @transform_6(%arg0: i32) -> (i32, i32) {
    %c0_i32 = arith.constant 0 : i32
    %c0_i32_0 = arith.constant 0 : i32
    %c0_i32_1 = arith.constant 0 : i32
    return %c0_i32, %c0_i32_0 : i32, i32
  }
  func.func @transform_7(%arg0: i32) -> (i32, i32) {
    %c0_i32 = arith.constant 0 : i32
    %c0_i32_0 = arith.constant 0 : i32
    %c0_i32_1 = arith.constant 0 : i32
    return %c0_i32, %c0_i32_0 : i32, i32
  }
  func.func @transform_8(%arg0: i32) -> (i32, i32) {
    %c0_i32 = arith.constant 0 : i32
    %c0_i32_0 = arith.constant 0 : i32
    return %arg0, %c0_i32 : i32, i32
  }
  func.func @transform_9(%arg0: i32) -> (i32, i32) {
    %c0_i32 = arith.constant 0 : i32
    %c0_i32_0 = arith.constant 0 : i32
    return %arg0, %c0_i32 : i32, i32
  }
}

</mosaic_0001>

<bundles_post_ra>
// kernel: conv_block_forward.2
= control target key start
LH: loop header
LB: loop body
LE: loop exit
PB: predicated region body
PF: predicated region fallthrough
CT: control target
= control target key end

     0   :  { %s475_s12 = smov 0   ;;  %s512_s0 = inlined_call_operand.vmem [shape: bf16[32,64], index: 0, kind: input, shape index: {}]   ;;  %s513_s1 = inlined_call_operand.vmem [shape: bf16[64,128], index: 1, kind: input, shape index: {}]   ;;  %s514_s2 = inlined_call_operand.vmem [shape: bf16[32,128], index: 2, kind: output, shape index: {0}]   ;;  %s515_s3 = inlined_call_operand.vmem [shape: f32[2,2,128], index: 3, kind: output, shape index: {1}]  }
   0x1 LB: > { %s481_s13 = sadd.s32 4294967295, %s451_s12   ;;  %p390_p0 = scmp.ge.s32.totalorder %s451_s12, 1  ;;  %s451_s12 = sphi %s475_s12, %s14_s12  }
   0x2   : > { %p141_p1 = scmp.lt.s32.totalorder %s451_s12, 3 }
   0x4   : > { %p142_p2 = pnand %p390_p0, %p141_p1 }
   0x5   : > { %v440_v0 = vld [vmem:[%s513_s1] sm:$0xff] (!%p142_p2)   ;;  %v453_v1 = vmov (!%p142_p2), 0.0   ;;  %v441_v2 = vld [vmem:[%s513_s1 + $0x8] sm:$0xff] (!%p142_p2)   ;;  %vm454_vm0 = vmmov (!%p142_p2), 0   ;;  %s391_s18 = sshll.u32 (!%p142_p2), %s481_s13, 1  ;;  %v442_v3 = vld [vmem:[%s513_s1 + $0x10] sm:$0xff] (!%p142_p2)  }
   0x6   : > { %145 = sbr.rel (%p142_p2) target bundleno = 254 (0xfe), region = 28  ;;  %418 = vmatprep.subr.bf16.mxu0 (!%p142_p2), %v453_v1  ;;  %426 = vmatprep.mubr.msk.bf16.mxu0 (!%p142_p2), %vm454_vm0, %v453_v1  ;;  %p170_p3 = scmp.lt.s32.totalorder (!%p142_p2), %s391_s18, 3  ;;  %v443_v4 = vld [vmem:[%s513_s1 + $0x18] sm:$0xff] (!%p142_p2)   ;;  %vm225_vm1 = vcmask (!%p142_p2), 523264   ;;  %vm296_vm2 = vcmask (!%p142_p2), 1040384  }
   0x7   : > { %419 = vmatpush3.bf16.msra.mxu0 (!%p142_p2), %v440_v0  ;;  %p181_p4 = scmp.lt.s32.totalorder (!%p142_p2), %s481_s13, 1 }
   0x8   : > { %420 = vmatprep.subr.bf16.mxu0 (!%p142_p2), %v453_v1 }
   0xb   : > { %421 = vmatpush3.bf16.msra.mxu0 (!%p142_p2), %v441_v2 }
   0xc   : > { %422 = vmatprep.subr.bf16.mxu0 (!%p142_p2), %v453_v1 }
   0xd   : > { %s517_s18 = smov (!%p170_p3, %s391_s18), 3  ;;  %s519_s13 = smov (!%p181_p4, %s481_s13), 1 }
   0xe   : > { %s392_s21 = sshll.u32 %s517_s18, 2  ;;  %s395_s30 = sshll.u32 %s519_s13, 1 }
   0xf   : > { %s173_s24 = scalar_lea.vmem %s512_s0, %s392_s21  ;;  %423 = vmatpush3.bf16.msra.mxu0 %v442_v3  ;;  %s179_s29 = scalar_lea.vmem %s514_s2, %s392_s21 }
  0x10   : > { %424 = vmatprep.subr.bf16.mxu0 %v453_v1  ;;  %v444_v5 = vld [vmem:[%s173_s24] sm:$0xff]   ;;  %s184_s6 = scalar_lea.vmem %s515_s3, %s395_s30 }
  0x13   : > { %425 = vmatpush3.bf16.msra.mxu0 %v443_v4 }
  0x16   : > { %427 = vmatmul.mubr.msk.bf16.vlgmr.msra.gmra.mrb[0].mxu0 %vm225_vm1, %v444_v5 }
  0xe9   : > { %v263_v6 = vpop.f32.mrb[0].mxu0 }
  0xea   : > { %v428_v7 = vpop.f32.mrb[1].mxu0  ;;  %v287_v9 = vmul.f32 %v263_v6, %v263_v6 }
  0xeb   : > { %v266_v8 = vpop.f32.mrb[2].mxu0 }
  0xec   : > { %v411_v10 = vpack.c.bf16 %v266_v8, %v263_v6  ;;  %v280_v11 = vadd.f32 %v266_v8, %v263_v6  ;;  %v288_v12 = vmul.f32 %v266_v8, %v266_v8  ;;  %v429_v13 = vpop.f32.mrb[3].mxu0 }
  0xee   : > { %412 = vst [vmem:[%s179_s29] sm:$0xff] %v411_v10   ;;  %v281_v14 = vrot.slane %v280_v11, 4  ;;  %v289_v15 = vadd.f32 %v288_v12, %v287_v9 }
  0xf0   : > { %v282_v16 = vadd.f32 %v281_v14, %v280_v11  ;;  %v290_v17 = vrot.slane %v289_v15, 4 }
  0xf2   : > { %v283_v18 = vrot.slane %v282_v16, 2  ;;  %v291_v19 = vadd.f32 %v290_v17, %v289_v15 }
  0xf4   : > { %v284_v20 = vadd.f32 %v283_v18, %v282_v16  ;;  %v292_v21 = vrot.slane %v291_v19, 2 }
  0xf6   : > { %v285_v22 = vrot.slane %v284_v20, 1  ;;  %v293_v23 = vadd.f32 %v292_v21, %v291_v19 }
  0xf8   : > { %v294_v24 = vrot.slane %v293_v23, 1  ;;  %v286_v25 = vadd.f32 %v285_v22, %v284_v20 }
  0xfa   : > { %v295_v26 = vadd.f32 %v294_v24, %v293_v23 }
  0xfc   : > { %v297_v27 = vsel %vm296_vm2, %v286_v25, %v295_v26 }
  0xfd   : > { %298 = vst [vmem:[%s184_s6] sm:$0x3] %v297_v27 }
  0xfe PF: > { %s14_s12 = sadd.s32 1, %s451_s12  }
  0xff   : > { %p11_p5 = scmp.ge.s32.totalorder %s14_s12, 4  }
 0x101   :  { %13 = sbr.rel (!%p11_p5) target bundleno = 1 (0x1), region = 70 }

// kernel: tile.18
= control target key start
LH: loop header
LB: loop body
LE: loop exit
PB: predicated region body
PF: predicated region fallthrough
CT: control target
= control target key end

     0   :  { %s28_s0 = inlined_call_operand.vmem [shape: f32[8], index: 0, kind: input, shape index: {}]   ;;  %s29_s1 = inlined_call_operand.vmem [shape: f32[16,8], index: 1, kind: output, shape index: {}]  }
   0x1   :  { %v4_v0 = vld [vmem:[%s28_s0] ss:$0 sm:$0xff] }
   0x2   :  { %5 = vst [vmem:[%s29_s1] sm:$0xff] %v4_v0  ;;  %8 = vst [vmem:[%s29_s1 + $0x8] sm:$0xff] %v4_v0 }

// kernel: tile.19
= control target key start
LH: loop header
LB: loop body
LE: loop exit
PB: predicated region body
PF: predicated region fallthrough
CT: control target
= control target key end

     0   :  { %s131_s10 = smov 120   ;;  %s132_s11 = smov 104   ;;  %vm3_vm0 = vcmask 64512   ;;  %vm9_vm1 = vcmask 1048512   ;;  %vm15_vm2 = vcmask 982912   ;;  %vm21_vm3 = vcmask 917312   ;;  %s207_s0 = inlined_call_operand.vmem [shape: f32[16,8], index: 0, kind: input, shape index: {}]   ;;  %s208_s1 = inlined_call_operand.vmem [shape: f32[1,128], index: 1, kind: output, shape index: {}]  }
   0x1   :  { %v101_v0 = vld [vmem:[%s207_s0 + $0xf] sm:$0x1]   ;;  %v103_v1 = vld [vmem:[%s207_s0 + $0xd] sm:$0x1]   ;;  %v102_v2 = vld [vmem:[%s207_s0 + $0xe] sm:$0x1]  }
   0x2   :  { %7 = vrot.lane.b32.xlu0 %v101_v0, %s131_s10  ;;  %19 = vrot.lane.b32.xlu1 %v103_v1, %s132_s11  ;;  %v104_v3 = vld [vmem:[%s207_s0 + $0xc] sm:$0x1]   ;;  %s133_s16 = smov 112   ;;  %s134_s17 = smov 96   ;;  %v105_v4 = vld [vmem:[%s207_s0 + $0xb] sm:$0x1]  }
   0x3   :  { %v106_v5 = vld [vmem:[%s207_s0 + $0xa] sm:$0x1]   ;;  %v2_v6 = vld [vmem:[%s207_s0] sm:$0x1]   ;;  %s135_s24 = smov 88   ;;  %s136_s25 = smov 80  }
   0x4   :  { %4 = vst.msk [vmem:[#allocation0] sm:$0x1] %vm3_vm0, %v2_v6   ;;  %v107_v7 = vld [vmem:[%s207_s0 + $0x9] sm:$0x1]   ;;  %v108_v8 = vld [vmem:[%s207_s0 + $0x8] sm:$0x1]  }
   0x5   :  { %s137_s30 = smov 72   ;;  %s138_s2 = smov 64   ;;  %v109_v9 = vld [vmem:[%s207_s0 + $0x7] sm:$0x1]   ;;  %v110_v10 = vld [vmem:[%s207_s0 + $0x6] sm:$0x1]  }
   0x6   :  { %13 = vrot.lane.b32.xlu0 %v102_v2, %s133_s16  ;;  %25 = vrot.lane.b32.xlu1 %v104_v3, %s134_s17  ;;  %s139_s7 = smov 56   ;;  %s140_s8 = smov 48   ;;  %v111_v11 = vld [vmem:[%s207_s0 + $0x5] sm:$0x1]   ;;  %v112_v12 = vld [vmem:[%s207_s0 + $0x4] sm:$0x1]  }
   0x7   :  { %s141_s13 = smov 40   ;;  %s142_s14 = smov 32   ;;  %v113_v13 = vld [vmem:[%s207_s0 + $0x3] sm:$0x1]   ;;  %v114_v14 = vld [vmem:[%s207_s0 + $0x2] sm:$0x1]  }
   0x8   :  { %s143_s19 = smov 24   ;;  %s144_s20 = smov 16   ;;  %v115_v15 = vld [vmem:[%s207_s0 + $0x1] sm:$0x1]   ;;  %vm27_vm4 = vcmask 851712   ;;  %vm33_vm5 = vcmask 786112  }
   0x9   :  { %s145_s0 = smov 8   ;;  %vm39_vm6 = vcmask 720512   ;;  %vm45_vm7 = vcmask 654912   ;;  %vm51_vm8 = vcmask 589312   ;;  %vm57_vm9 = vcmask 523712  }
   0xa   :  { %31 = vrot.lane.b32.xlu0 %v105_v4, %s135_s24  ;;  %37 = vrot.lane.b32.xlu1 %v106_v5, %s136_s25  ;;  %vm63_vm10 = vcmask 458112   ;;  %vm69_vm11 = vcmask 392512   ;;  %vm75_vm12 = vcmask 326912   ;;  %vm81_vm13 = vcmask 261312  }
   0xb   :  { %vm87_vm14 = vcmask 195712   ;;  %vm93_vm15 = vcmask 130112  }
   0xe   :  { %43 = vrot.lane.b32.xlu0 %v107_v7, %s137_s30  ;;  %49 = vrot.lane.b32.xlu1 %v108_v8, %s138_s2 }
  0x12   :  { %55 = vrot.lane.b32.xlu0 %v109_v9, %s139_s7  ;;  %61 = vrot.lane.b32.xlu1 %v110_v10, %s140_s8 }
  0x16   :  { %67 = vrot.lane.b32.xlu0 %v111_v11, %s141_s13  ;;  %73 = vrot.lane.b32.xlu1 %v112_v12, %s142_s14 }
  0x1a   :  { %79 = vrot.lane.b32.xlu0 %v113_v13, %s143_s19  ;;  %85 = vrot.lane.b32.xlu1 %v114_v14, %s144_s20 }
  0x1e   :  { %91 = vrot.lane.b32.xlu0 %v115_v15, %s145_s0 }
  0x74   :  { %v8_v16 = vpop.permute.xlu0 %7   ;;  %v20_v17 = vpop.permute.xlu1 %19  }
  0x75   :  { %10 = vst.msk [vmem:[#allocation0] sm:$0x1] %vm9_vm1, %v8_v16  }
  0x78   :  { %v14_v18 = vpop.permute.xlu0 %13   ;;  %v26_v19 = vpop.permute.xlu1 %25  }
  0x79   :  { %16 = vst.msk [vmem:[#allocation0] sm:$0x1] %vm15_vm2, %v14_v18  }
  0x7a   :  { %22 = vst.msk [vmem:[#allocation0] sm:$0x1] %vm21_vm3, %v20_v17  }
  0x7b   :  { %28 = vst.msk [vmem:[#allocation0] sm:$0x1] %vm27_vm4, %v26_v19  }
  0x7c   :  { %v32_v20 = vpop.permute.xlu0 %31   ;;  %v38_v21 = vpop.permute.xlu1 %37  }
  0x7d   :  { %34 = vst.msk [vmem:[#allocation0] sm:$0x1] %vm33_vm5, %v32_v20  }
  0x7e   :  { %40 = vst.msk [vmem:[#allocation0] sm:$0x1] %vm39_vm6, %v38_v21  }
  0x80   :  { %v44_v22 = vpop.permute.xlu0 %43   ;;  %v50_v23 = vpop.permute.xlu1 %49  }
  0x81   :  { %46 = vst.msk [vmem:[#allocation0] sm:$0x1] %vm45_vm7, %v44_v22  }
  0x82   :  { %52 = vst.msk [vmem:[#allocation0] sm:$0x1] %vm51_vm8, %v50_v23  }
  0x84   :  { %v56_v24 = vpop.permute.xlu0 %55   ;;  %v62_v25 = vpop.permute.xlu1 %61  }
  0x85   :  { %58 = vst.msk [vmem:[#allocation0] sm:$0x1] %vm57_vm9, %v56_v24  }
  0x86   :  { %64 = vst.msk [vmem:[#allocation0] sm:$0x1] %vm63_vm10, %v62_v25  }
  0x88   :  { %v68_v26 = vpop.permute.xlu0 %67   ;;  %v74_v27 = vpop.permute.xlu1 %73  }
  0x89   :  { %70 = vst.msk [vmem:[#allocation0] sm:$0x1] %vm69_vm11, %v68_v26  }
  0x8a   :  { %76 = vst.msk [vmem:[#allocation0] sm:$0x1] %vm75_vm12, %v74_v27  }
  0x8c   :  { %v80_v28 = vpop.permute.xlu0 %79   ;;  %v86_v29 = vpop.permute.xlu1 %85  }
  0x8d   :  { %82 = vst.msk [vmem:[#allocation0] sm:$0x1] %vm81_vm13, %v80_v28  }
  0x8e   :  { %88 = vst.msk [vmem:[#allocation0] sm:$0x1] %vm87_vm14, %v86_v29  }
  0x90   :  { %v92_v30 = vpop.permute.xlu0 %91  }
  0x91   :  { %94 = vst.msk [vmem:[#allocation0] sm:$0x1] %vm93_vm15, %v92_v30  }
  0x98   :  { %v98_v31 = vld [vmem:[#allocation0] sm:$0x1] }
  0x99   :  { %100 = vst [vmem:[%s208_s1] sm:$0x1] %v98_v31 }

// kernel: conv_block_forward.3
= control target key start
LH: loop header
LB: loop body
LE: loop exit
PB: predicated region body
PF: predicated region fallthrough
CT: control target
= control target key end

     0   :  { %15 = vsyncpa [#allocation3], 0  ;;  %s1621_s0 = inlined_call_operand.vmem [shape: bf16[32,128], index: 0, kind: input, shape index: {}]   ;;  %s1622_s1 = inlined_call_operand.vmem [shape: f32[1,128], index: 1, kind: input, shape index: {}]   ;;  %s1623_s2 = inlined_call_operand.vmem [shape: f32[1,128], index: 2, kind: input, shape index: {}]   ;;  %s1624_s3 = inlined_call_operand.vmem [shape: bf16[384,128], index: 3, kind: input, shape index: {}]   ;;  %s1625_s4 = inlined_call_operand.vmem [shape: f32[1,128], index: 4, kind: input, shape index: {}]   ;;  %s1626_s5 = inlined_call_operand.vmem [shape: bf16[128,16], index: 5, kind: input, shape index: {}]   ;;  %s1627_s6 = inlined_call_operand.vmem [shape: f32[1,16], index: 6, kind: input, shape index: {}]   ;;  %s1628_s7 = inlined_call_operand.vmem [shape: bf16[16,128], index: 7, kind: input, shape index: {}]   ;;  %s1629_s8 = inlined_call_operand.vmem [shape: f32[32,128], index: 8, kind: output, shape index: {0}]   ;;  %s1630_s9 = inlined_call_operand.hbm [shape: f32[32,16], index: 9, kind: output, shape index: {1}]  }
   0x1   :  { %17 = vsyncpa [#allocation3 + $0x1], 0  ;;  %s1355_s30 = smov 0   ;;  %s1357_s10 = smov 0  }
   0x2   :  { %s1359_s11 = smov 0   ;;  %s1361_s12 = smov 0  }
   0x3 LB: > { %s1376_s13 = sadd.s32 4294967295, %s1297_s12   ;;  %s997_s14 = sadd.s32 4294967294, %s1297_s12   ;;  %s1297_s12 = sphi %s1361_s12, %s1638_s12   ;;  %s1293_s11 = sphi %s1359_s11, %s1637_s11   ;;  %s1289_s10 = sphi %s1357_s10, %s1636_s10   ;;  %s1285_s30 = sphi %s1355_s30, %s1635_s30  }
   0x4   : > { %s1380_s15 = sadd.s32 1, %s1297_s12   ;;  %s229_s16 = sadd.s32 1, %s1293_s11 }
   0x5   : > { %s226_s17 = ssub.s32 %s1297_s12, %s1380_s15  ;;  %p239_p0 = scmp.ne.s32.totalorder %s1293_s11, %s1289_s10 }
   0x6   : > { %p227_p1 = scmp.eq.s32.totalorder %s226_s17, 0  ;;  %p240_p2 = scmp.eq.s32.totalorder %s1376_s13, 1 }
   0x7   : > { %p245_p3 = scmp.ne.s32.totalorder %s1289_s10, %s1285_s30  ;;  %p246_p4 = scmp.eq.s32.totalorder %s997_s14, 1 }
   0x8   : > { %s1391_s18 = scalar_select %p227_p1, %s1293_s11, %s229_s16  }
   0x9   : > { %p1393_p5 = por %p240_p2, %p239_p0  ;;  %p1397_p6 = por %p246_p4, %p245_p3 }
   0xa   : > { %p1000_p7 = scmp.ge.s32.totalorder %s1297_s12, 1  ;;  %p294_p8 = scmp.lt.s32.totalorder %s1297_s12, 3 }
   0xc   : > { %p295_p9 = pnand %p1000_p7, %p294_p8 }
   0xd   : > { %v1194_v0 = vld [vmem:[%s1624_s3 + $0x40] sm:$0xff] (!%p295_p9)   ;;  %v1299_v2 = vmov (!%p295_p9), 0.0   ;;  %v1197_v4 = vld [vmem:[%s1624_s3 + $0x48] sm:$0xff] (!%p295_p9)   ;;  %v1200_v7 = vld [vmem:[%s1624_s3 + $0x50] sm:$0xff] (!%p295_p9)   ;;  %s1002_s23 = sshll.u32 (!%p295_p9), %s1376_s13, 1  ;;  %vm1300_vm0 = vmmov (!%p295_p9), 0   ;;  %v373_v15 = vlaneseq (!%p295_p9) }
   0xe   : > { %298 = sbr.rel (%p295_p9) target bundleno = 730 (0x2da), region = 52  ;;  %v1195_v1 = vld [vmem:[%s1624_s3] sm:$0xff] (!%p295_p9)   ;;  %1104 = vmatprep.subr.bf16.mxu1 (!%p295_p9), %v1299_v2  ;;  %1062 = vmatprep.subr.bf16.mxu0 (!%p295_p9), %v1194_v0  ;;  %v1198_v5 = vld [vmem:[%s1624_s3 + $0x8] sm:$0xff] (!%p295_p9)   ;;  %v1201_v8 = vld [vmem:[%s1624_s3 + $0x10] sm:$0xff] (!%p295_p9)   ;;  %p336_p10 = scmp.lt.s32.totalorder (!%p295_p9), %s1002_s23, 3  ;;  %vm1301_vm5 = vmmov (!%p295_p9), 1  }
   0xf   : > { %v1196_v3 = vld [vmem:[%s1624_s3 + $0x80] sm:$0xff] (!%p295_p9)   ;;  %1063 = vmatpush3.bf16.msra.mxu0 (!%p295_p9), %v1195_v1  ;;  %v1199_v6 = vld [vmem:[%s1624_s3 + $0x88] sm:$0xff] (!%p295_p9)   ;;  %v1202_v9 = vld [vmem:[%s1624_s3 + $0x90] sm:$0xff] (!%p295_p9)   ;;  %1120 = vmatprep.mubr.msk.bf16.mxu1 (!%p295_p9), %vm1300_vm0, %v1299_v2  ;;  %v374_v19 = vshrl.u32 (!%p295_p9), %v373_v15, 7  ;;  %s332_s17 = sand.u32 (!%p295_p9), 1, %s1289_s10   ;;  %vm815_vm8 = vcmask (!%p295_p9), 130048  }
  0x10   : > { %1105 = vmatpush3.bf16.msra.mxu1 (!%p295_p9), %v1196_v3  ;;  %1064 = vmatprep.subr.bf16.mxu0 (!%p295_p9), %v1197_v4  ;;  %v1203_v10 = vld [vmem:[%s1624_s3 + $0x58] sm:$0xff] (!%p295_p9)   ;;  %v1206_v13 = vld [vmem:[%s1624_s3 + $0x60] sm:$0xff] (!%p295_p9)   ;;  %v1209_v17 = vld [vmem:[%s1624_s3 + $0x68] sm:$0xff] (!%p295_p9)   ;;  %s1001_s21 = sshll.u32 (!%p295_p9), %s332_s17, 4  ;;  %s1057_s26 = sshll.u32 (!%p295_p9), %s1376_s13, 8 }
  0x11   : > { %1106 = vmatprep.subr.bf16.mxu1 (!%p295_p9), %v1299_v2  ;;  %v1204_v11 = vld [vmem:[%s1624_s3 + $0x18] sm:$0xff] (!%p295_p9)   ;;  %v1207_v14 = vld [vmem:[%s1624_s3 + $0x20] sm:$0xff] (!%p295_p9)   ;;  %v1210_v18 = vld [vmem:[%s1624_s3 + $0x28] sm:$0xff] (!%p295_p9)   ;;  %v375_v23 = vadd.s32 (!%p295_p9), 8, %v374_v19  ;;  %v380_v30 = vand.u32 (!%p295_p9), 15, %v374_v19  ;;  %vm404_vm2 = vcmp.lt.s32.totalorder (!%p295_p9), %v374_v19, 1 }
  0x12   : > { %v1205_v12 = vld [vmem:[%s1624_s3 + $0x98] sm:$0xff] (!%p295_p9)   ;;  %v1208_v16 = vld [vmem:[%s1624_s3 + $0xa0] sm:$0xff] (!%p295_p9)   ;;  %v1211_v20 = vld [vmem:[%s1624_s3 + $0xa8] sm:$0xff] (!%p295_p9)   ;;  %vm413_vm4 = vcmp.lt.s32.totalorder (!%p295_p9), %v374_v19, 7  ;;  %s334_s25 = scalar_lea.vmem (!%p295_p9), [#allocation2], %s1001_s21  ;;  %s1574_s14 = scalar_lea.sflag (!%p295_p9), [#allocation3], %s332_s17 }
  0x13   : > { %1065 = vmatpush3.bf16.msra.mxu0 (!%p295_p9), %v1198_v5  ;;  %v1212_v21 = vld [vmem:[%s1624_s3 + $0x70] sm:$0xff] (!%p295_p9)   ;;  %v1006_v26 = vld [vmem:[%s1622_s1] ss:$0 sm:$0xff] (!%p295_p9)  ;;  %v1215_v27 = vld [vmem:[%s1624_s3 + $0x78] sm:$0xff] (!%p295_p9)   ;;  %v387_v34 = vand.u32 (!%p295_p9), 15, %v375_v23  ;;  %vm400_vm1 = vcmp.ge.s32.totalorder (!%p295_p9), %v380_v30, 1 }
  0x14   : > { %1107 = vmatpush3.bf16.msra.mxu1 (!%p295_p9), %v1199_v6  ;;  %1066 = vmatprep.subr.bf16.mxu0 (!%p295_p9), %v1200_v7  ;;  %v1213_v22 = vld [vmem:[%s1624_s3 + $0x30] sm:$0xff] (!%p295_p9)   ;;  %v1007_v31 = vld [vmem:[%s1623_s2] ss:$0 sm:$0xff] (!%p295_p9)  ;;  %v1216_v35 = vld [vmem:[%s1624_s3 + $0x38] sm:$0xff] (!%p295_p9)   ;;  %s1302_s22 = smov (!%p295_p9), [#allocation2]  }
  0x15   : > { %1108 = vmatprep.subr.bf16.mxu1 %v1299_v2  ;;  %s1640_s23 = smov (!%p336_p10, %s1002_s23), 3  ;;  %v1214_v24 = vld [vmem:[%s1624_s3 + $0xb0] sm:$0xff]   ;;  %v1217_v38 = vld [vmem:[%s1624_s3 + $0xb8] sm:$0xff]   ;;  %vm1498_vm3 = vcmp.le.s32.totalorder %v387_v34, 14  ;;  %vm1033_vm6 = vmpackc.low %vm1301_vm5, %vm400_vm1  ;;  %s1239_s24 = sshll.u32 %s1302_s22, 4  ;;  %s1240_s24 = int_to_ptr.vmem [resolvable:$false] %s1239_s24 }
  0x16   : > { %s1003_s16 = sshll.u32 %s1640_s23, 2  ;;  %vm1036_vm7 = vmpackc.low %vm1498_vm3, %vm1301_vm5  ;;  %v1218_v51 = vld [vmem:[%s1626_s5] sm:$0xff]   ;;  %v1219_v54 = vld [vmem:[%s1626_s5 + $0x8] sm:$0xff]  }
  0x17   : > { %1067 = vmatpush3.bf16.msra.mxu0 %v1201_v8  ;;  %s339_s29 = scalar_lea.vmem %s1621_s0, %s1003_s16  ;;  %v1220_v55 = vld [vmem:[%s1626_s5 + $0x10] sm:$0xff]   ;;  %v1221_v56 = vld [vmem:[%s1626_s5 + $0x18] sm:$0xff]   ;;  %v1222_v57 = vld [vmem:[%s1626_s5 + $0x20] sm:$0xff]   ;;  %s910_s16 = sshll.u32 %s334_s25, 4  ;;  %s1564_s16 = int_to_ptr.vmem [resolvable:$true] %s910_s16 }
  0x18   : > { %1109 = vmatpush3.bf16.msra.mxu1 %v1202_v9  ;;  %1068 = vmatprep.subr.bf16.mxu0 %v1203_v10  ;;  %v1059_v25 = vld [vmem:[%s339_s29] sm:$0xff]   ;;  %v1223_v58 = vld [vmem:[%s1626_s5 + $0x28] sm:$0xff]   ;;  %v1224_v59 = vld [vmem:[%s1626_s5 + $0x30] sm:$0xff]   ;;  %s1570_s29 = scalar_lea.hbm %s1630_s9, %s1057_s26  ;;  %s1235_s21 = scalar_lea.vmem %s1564_s16, 256 }
  0x19   : > { %1110 = vmatprep.subr.bf16.mxu1 %v1299_v2  ;;  %v1060_v28 = vunpack.c.l.bf16 %v1059_v25  ;;  %v1061_v29 = vunpack.c.h.bf16 %v1059_v25  ;;  %v1225_v60 = vld [vmem:[%s1626_s5 + $0x38] sm:$0xff]   ;;  %v1008_v0 = vld [vmem:[%s1625_s4] ss:$0 sm:$0xff]  ;;  %p1236_p11 = scmp.ne.s32.totalorder %s1564_s16, %s1235_s21  ;;  %p1242_p0 = scmp.lt.s32.totalorder %s1564_s16, %s1240_s24 }
  0x1b   : > { %1069 = vmatpush3.bf16.msra.mxu0 %v1204_v11  ;;  %v360_v32 = vmul.f32 %v1060_v28, %v1006_v26  ;;  %v361_v33 = vmul.f32 %v1061_v29, %v1006_v26  ;;  %p1237_p12 = pnand %p1236_p11, %p1393_p5 }
  0x1c   : > { %1111 = vmatpush3.bf16.msra.mxu1 %v1205_v12  ;;  %1070 = vmatprep.subr.bf16.mxu0 %v1206_v13  ;;  %v1226_v13 = vld [vmem:[%s1628_s7] sm:$0xff]  }
  0x1d   : > { %1112 = vmatprep.subr.bf16.mxu1 %v1299_v2  ;;  %v369_v36 = vadd.f32 %v1007_v31, %v360_v32  ;;  %v370_v37 = vadd.f32 %v1007_v31, %v361_v33  ;;  %p1238_p13 = pneg %p1237_p12 }
  0x1f   : > { %1071 = vmatpush3.bf16.msra.mxu0 %v1207_v14  ;;  %v371_v39 = vmax.f32 %v369_v36, 0.0  ;;  %v372_v40 = vmax.f32 %v370_v37, 0.0  ;;  %v1039_v14 = vld [vmem:[%s1627_s6] ss:$0 sm:$0xff] }
  0x20   : > { %1113 = vmatpush3.bf16.msra.mxu1 %v1208_v16  ;;  %1072 = vmatprep.subr.bf16.mxu0 %v1209_v17 }
  0x21   : > { %1114 = vmatprep.subr.bf16.mxu1 %v1299_v2  ;;  %v402_v42 = vrot.slane %v371_v39, 7  ;;  %v403_v43 = vrot.slane %v372_v40, 7  ;;  %v411_v44 = vrot.slane %v371_v39, 1  ;;  %v412_v45 = vrot.slane %v372_v40, 1 }
  0x22   : > { %v419_v46 = vpack.c.bf16 %v372_v40, %v371_v39 }
  0x23   : > { %1073 = vmatpush3.bf16.msra.mxu0 %v1210_v18  ;;  %v405_v47 = vsel %vm404_vm2, %v402_v42, %v403_v43  ;;  %v406_v48 = vsel %vm404_vm2, %v403_v43, %v402_v42  ;;  %v414_v49 = vsel %vm413_vm4, %v411_v44, %v412_v45  ;;  %v415_v50 = vsel %vm413_vm4, %v412_v45, %v411_v44 }
  0x24   : > { %1115 = vmatpush3.bf16.msra.mxu1 %v1211_v20  ;;  %1074 = vmatprep.subr.bf16.mxu0 %v1212_v21  ;;  %v1034_v52 = vpack.c.bf16 %v405_v47, %v406_v48  ;;  %v1037_v53 = vpack.c.bf16 %v415_v50, %v414_v49 }
  0x25   : > { %1116 = vmatprep.subr.bf16.mxu1 %v1299_v2  ;;  %652 = vmatprep.mubr.bf16.mxu0 %v419_v46 }
  0x27   : > { %1075 = vmatpush3.bf16.msra.mxu0 %v1213_v22 }
  0x28   : > { %1117 = vmatpush3.bf16.msra.mxu1 %v1214_v24  ;;  %1076 = vmatprep.subr.bf16.mxu0 %v1215_v27 }
  0x29   : > { %1118 = vmatprep.subr.bf16.mxu1 %v1299_v2 }
  0x2b   : > { %1077 = vmatpush3.bf16.msra.mxu0 %v1216_v35 }
  0x2c   : > { %1119 = vmatpush3.bf16.msra.mxu1 %v1217_v38  ;;  %1124 = vmatprep.subr.bf16.mxu0 %v1299_v2 }
  0x2d   : > { %1144 = vmatprep.subr.bf16.mxu1 %v1299_v2 }
  0x2e   : > { %1035 = vmatmul.mubr.msk.bf16.vlgmr.msra.gmra.mrb[0].mxu0 %vm1033_vm6, %v1034_v52 }
  0x2f   : > { %1121 = vmatmul.mubr.msk.bf16.vlgmr.msra.gmra.mrb[0].mxu1 %vm1036_vm7, %v1037_v53  ;;  %1125 = vmatpush3.bf16.msra.mxu0 %v1218_v51 }
  0x30   : > { %1140 = vmatprep.mubr.msk.bf16.mxu0 %vm1300_vm0, %v1299_v2  ;;  %1126 = vmatprep.subr.bf16.mxu0 %v1299_v2 }
  0x31   : > { %1146 = vmatprep.mubr.msk.bf16.mxu1 %vm1300_vm0, %v1299_v2  ;;  %1145 = vmatpush3.bf16.msra.mxu1 %v1226_v13 }
  0x33   : > { %1127 = vmatpush3.bf16.msra.mxu0 %v1219_v54 }
  0x34   : > { %1128 = vmatprep.subr.bf16.mxu0 %v1299_v2 }
  0x37   : > { %1129 = vmatpush3.bf16.msra.mxu0 %v1220_v55 }
  0x38   : > { %1130 = vmatprep.subr.bf16.mxu0 %v1299_v2 }
  0x3b   : > { %1131 = vmatpush3.bf16.msra.mxu0 %v1221_v56 }
  0x3c   : > { %1132 = vmatprep.subr.bf16.mxu0 %v1299_v2 }
  0x3f   : > { %1133 = vmatpush3.bf16.msra.mxu0 %v1222_v57 }
  0x40   : > { %1134 = vmatprep.subr.bf16.mxu0 %v1299_v2 }
  0x43   : > { %1135 = vmatpush3.bf16.msra.mxu0 %v1223_v58 }
  0x44   : > { %1136 = vmatprep.subr.bf16.mxu0 %v1299_v2 }
  0x47   : > { %1137 = vmatpush3.bf16.msra.mxu0 %v1224_v59 }
  0x48   : > { %1138 = vmatprep.subr.bf16.mxu0 %v1299_v2 }
  0x4b   : > { %1139 = vmatpush3.bf16.msra.mxu0 %v1225_v60 }
 0x101   : > { %v1078_v61 = vpop.f32.mrb[0].mxu0 }
 0x102   : > { %v695_v62 = vpop.f32.mrb[0].mxu1  ;;  %v1079_v63 = vpop.f32.mrb[1].mxu0 }
 0x103   : > { %v1122_v1 = vpop.f32.mrb[1].mxu1  ;;  %v1080_v3 = vadd.f32 %v1079_v63, %v1078_v61  ;;  %v1081_v4 = vpop.f32.mrb[2].mxu0 }
 0x104   : > { %v698_v5 = vpop.f32.mrb[2].mxu1  ;;  %v1082_v6 = vpop.f32.mrb[3].mxu0 }
 0x105   : > { %v1123_v2 = vpop.f32.mrb[3].mxu1  ;;  %v655_v7 = vadd.f32 %v1080_v3, %v1008_v0  ;;  %v1083_v8 = vadd.f32 %v1082_v6, %v1081_v4 }
 0x107   : > { %v1546_v9 = vadd.f32 %v695_v62, %v655_v7  ;;  %v658_v10 = vadd.f32 %v1083_v8, %v1008_v0 }
 0x109   : > { %v1548_v11 = vadd.f32 %v698_v5, %v658_v10 }
 0x10b   : > { %v702_v12 = vpack.c.bf16 %v1548_v11, %v1546_v9 }
 0x10d   : > { %1141 = vmatmul.mubr.bf16.vlgmr.msra.gmra.mrb[4].mxu0 %v702_v12 }
 0x1e0   : > { %v808_v15 = vpop.f32.mrb[4].mxu0 }
 0x1e1   : > { %v809_v16 = vadd.f32 %v1039_v14, %v808_v15  ;;  %v1142_v17 = vpop.f32.mrb[5].mxu0 }
 0x1e2   : > { %v811_v18 = vpop.f32.mrb[6].mxu0 }
 0x1e3   : > { %816 = vst.msk [vmem:[%s334_s25] sm:$0xff] %vm815_vm8, %v809_v16  ;;  %v1048_v19 = vmul.f32 -1.442695, %v809_v16  ;;  %v812_v20 = vadd.f32 %v1039_v14, %v811_v18  ;;  %v1143_v21 = vpop.f32.mrb[7].mxu0 }
 0x1e5   : > { %1227 = vpow2.f32 %v1048_v19  ;;  %817 = vst.msk [vmem:[%s334_s25 + $0x8] sm:$0xff] %vm815_vm8, %v812_v20  ;;  %v1049_v22 = vmul.f32 -1.442695, %v812_v20  ;;  %s1241_s25 = scalar_lea.vmem %s1240_s24, 512 }
 0x1e6   : > { %p1243_p1 = scmp.lt.s32.totalorder %s1241_s25, %s1235_s21 }
 0x1e7   : > { %1229 = vpow2.f32 %v1049_v22 }
 0x1e8   : > { %p1244_p2 = por %p1243_p1, %p1242_p0 }
 0x1ea   : > { %p1245_p3 = pnand %p1244_p2, %p1238_p13 }
 0x1ef   : > { %v1228_v23 = vpop.eup %1227 }
 0x1f0   : > { %v824_v24 = vadd.f32 1.0, %v1228_v23 }
 0x1f1   : > { %v1230_v25 = vpop.eup %1229 }
 0x1f2   : > { %v825_v26 = vadd.f32 1.0, %v1230_v25  ;;  %1231 = vrcp.f32 %v824_v24 }
 0x1f4   : > { %1233 = vrcp.f32 %v825_v26 }
 0x1fc   : > { %v1232_v27 = vpop.eup %1231 }
 0x1fe   : > { %v1234_v28 = vpop.eup %1233 }
 0x1ff   : > { %v830_v29 = vpack.c.bf16 %v1234_v28, %v1232_v27 }
 0x201   : > { %1147 = vmatmul.mubr.msk.bf16.vlgmr.msra.gmra.mrb[4].mxu1 %vm815_vm8, %v830_v29 }
 0x202   : > { %1248 = shalt.err (!%p1245_p3)
}
 0x203   : > { %s1249_s13 = scalar_lea.hbm %s1570_s29, 256  ;;  %s1253_s27 = scalar_lea.hbm %s1630_s9, 512 }
 0x204   : > { %p1250_p4 = scmp.ne.s32.totalorder %s1570_s29, %s1249_s13  ;;  %p1254_p9 = scmp.lt.u32.totalorder %s1570_s29, %s1630_s9 }
 0x205   : > { %p1255_p10 = scmp.lt.u32.totalorder %s1253_s27, %s1249_s13  ;;  %p1257_p12 = scmp.lt.u32.totalorder %s1249_s13, %s1570_s29 }
 0x206   : > { %p1251_p7 = pnand %p1250_p4, %p1393_p5 }
 0x207   : > { %p1256_p11 = por %p1255_p10, %p1254_p9 }
 0x208   : > { %p1252_p8 = pneg %p1251_p7 }
 0x209   : > { %p1258_p13 = por %p1257_p12, %p1256_p11 }
 0x20b   : > { %p1259_p0 = pnand %p1258_p13, %p1252_p8 }
 0x20d   : > { %1262 = shalt.err (!%p1259_p0)
}
 0x20e   : > { %s1303_s21 = smov 128   ;;  %s1304_s24 = smov 8  }
 0x20f   : > { %1150 = dma.vmem_to_hbm [thread:$0]  (%p1393_p5), %s1564_s16, 256, %s1570_s29, %s1574_s14, %s1303_s21, %s1303_s21, %s1304_s24  }
 0x210   : > { %s1005_s25 = sshll.u32 %s1640_s23, 3 }
 0x211   : > { %s345_s28 = scalar_lea.vmem %s1629_s8, %s1005_s25 }
 0x2d4   : > { %v876_v30 = vpop.f32.mrb[4].mxu1 }
 0x2d5   : > { %v883_v31 = vmul.f32 %v876_v30, %v1546_v9  ;;  %v1148_v32 = vpop.f32.mrb[5].mxu1 }
 0x2d6   : > { %v879_v33 = vpop.f32.mrb[6].mxu1 }
 0x2d7   : > { %885 = vst [vmem:[%s345_s28] sm:$0xff] %v883_v31  ;;  %v884_v34 = vmul.f32 %v879_v33, %v1548_v11  ;;  %v1149_v35 = vpop.f32.mrb[7].mxu1 }
 0x2d9   : > { %886 = vst [vmem:[%s345_s28 + $0x8] sm:$0xff] %v884_v34 }
 0x2da PF: > { %p1156_p5 = scmp.ge.s32.totalorder %s1297_s12, 2  ;;  %s933_s19 = sand.u32 1, %s1285_s30  }
 0x2db   : > { %s934_s23 = scalar_lea.sflag [#allocation3], %s933_s19 }
 0x2dc   : > { %p1153_p1 = pnand %p1156_p5, %p1397_p6 }
 0x2de   : > { %1280 = dma.done.wait (!%p1153_p1), %s934_s23, 256  }
 0x2df   : > { %1282 = vsyncadd (!%p1153_p1), %s934_s23, 4294967040  ;;  %p20_p2 = scmp.ge.s32.totalorder %s1380_s15, 4   ;;  %s1635_s30 = smov %s1289_s10 }
 0x2e0   : > { %s1636_s10 = smov %s1293_s11  ;;  %s1637_s11 = smov %s1391_s18 }
 0x2e1   : > { %s1638_s12 = smov %s1380_s15  ;;  %22 = sbr.rel (!%p20_p2) target bundleno = 3 (0x3), region = 99 }
 0x2e8   :  { %939 = vsyncpa [#allocation3], 1 }
 0x2e9   :  { %941 = vsyncpa [#allocation3 + $0x1], 1 }

</bundles_post_ra>
